<compile_context>
chip_gen: v6e
topology: v6e:2x2x1
jax: 0.10.0
libtpu: 0.0.40
codegen_flags: <defaults>
</compile_context>

<pallas_src>
import functools

import jax
import jax.numpy as jnp
from jax.experimental import pallas as pl
from jax.experimental.pallas import tpu as pltpu


def _round_up(a, b):
    return (a + b - 1) // b * b


def _combined_loss_kernel(logits_ref, labels_ref, acc_ref):
    # acc_ref block: (1, C, 4); columns = [ce, intersection, prob_sum, count].
    # It is resident across the pixel-tile axis for a given batch row, so
    # initialize it on the first tile of each batch row.
    @pl.when(pl.program_id(1) == 0)
    def _init():
        acc_ref[...] = jnp.zeros_like(acc_ref)

    logits = logits_ref[0].astype(jnp.float32)          # (C, T): pixels on lanes
    labels = labels_ref[0]                              # (1, T) int32, -1 = pad
    c, t = logits.shape

    cls = jax.lax.broadcasted_iota(jnp.int32, (c, t), 0)
    valid = (labels >= 0).astype(jnp.float32)           # (1, T)
    onehot = jnp.where(cls == labels, 1.0, 0.0) * valid  # (C, T)

    # Numerically stable softmax along the class (sublane) axis.
    m = jnp.max(logits, axis=0, keepdims=True)          # (1, T)
    z = logits - m
    e = jnp.exp(z)
    s = jnp.sum(e, axis=0, keepdims=True)               # (1, T)
    inv_s = pl.reciprocal(s, approx=False)              # EUP; exact keeps 1e-4 rtol
    log_s = jnp.log(s)

    # Per-class partial reductions over the pixel (lane) axis -> (C, 1).
    # CE per valid pixel = log(s) - z[label]; attributed to its class row so
    # all four statistics share the same (C, 1) shape and one fused store.
    ce_c = jnp.sum(onehot * (log_s - z), axis=1, keepdims=True)
    inter_c = jnp.sum(onehot * e * inv_s, axis=1, keepdims=True)
    psum_c = jnp.sum(e * (inv_s * valid), axis=1, keepdims=True)
    cnt_c = jnp.sum(onehot, axis=1, keepdims=True)

    stats = jnp.concatenate([ce_c, inter_c, psum_c, cnt_c], axis=1)  # (C, 4)
    acc_ref[...] += stats[None]


@functools.partial(jax.jit, static_argnames=("smooth", "tile_pixels"))
def combined_loss(logits_nchw, labels_nhw, smooth=1.0, tile_pixels=2048):
    """CrossEntropyLoss(logits, true) + DiceLoss(logits, true), both mean-reduced."""
    n, c, h, w = logits_nchw.shape
    hw = h * w
    p = n * hw

    # Free reshapes: no NCHW->NHWC transpose, keep the logits' native dtype
    # (cast to f32 happens inside the kernel, halving HBM traffic for bf16).
    x = logits_nchw.reshape(n, c, hw)
    y = labels_nhw.reshape(n, 1, hw).astype(jnp.int32)

    # Pick the largest pixel tile that keeps the double-buffered inputs well
    # under the default scoped-VMEM budget on every TPU generation
    # (v5e: 16 MiB, v6e/v7x: 32 MiB scoped; v7x physical VMEM is 64 MiB).
    itemsize = jnp.dtype(logits_nchw.dtype).itemsize
    bytes_per_px = c * itemsize + 4                      # logits + int32 label
    vmem_budget = 8 * 1024 * 1024
    max_tile = max(128, (vmem_budget // (2 * bytes_per_px)) // 128 * 128)
    tile = min(int(tile_pixels), max_tile, _round_up(hw, 128))
    tile = max(128, tile // 128 * 128)

    hw_pad = _round_up(hw, tile)
    pad = hw_pad - hw
    if pad:
        x = jnp.pad(x, ((0, 0), (0, 0), (0, pad)))
        y = jnp.pad(y, ((0, 0), (0, 0), (0, pad)), constant_values=-1)

    acc = pl.pallas_call(
        _combined_loss_kernel,
        out_shape=jax.ShapeDtypeStruct((n, c, 4), jnp.float32),
        grid_spec=pltpu.PrefetchScalarGridSpec(
            num_scalar_prefetch=0,
            grid=(n, hw_pad // tile),
            in_specs=[
                pl.BlockSpec((1, c, tile), lambda b, t: (b, 0, t)),
                pl.BlockSpec((1, 1, tile), lambda b, t: (b, 0, t)),
            ],
            out_specs=pl.BlockSpec((1, c, 4), lambda b, t: (b, 0, 0)),
        ),
        compiler_params=pltpu.CompilerParams(
            dimension_semantics=("parallel", "arbitrary")),
    )(x, y)

    # Final scalar combine (cheap glue).
    totals = jnp.sum(acc, axis=0)                        # (C, 4)
    ce = jnp.sum(totals[:, 0]) / p                       # mean CE over all pixels
    intersection = totals[:, 1]
    cardinality = totals[:, 2] + totals[:, 3]            # sum(probs) + class counts
    dice = (2.0 * intersection + smooth) / (cardinality + smooth)
    dice_loss = 1.0 - jnp.mean(dice)
    # TODO(synk): nn.CrossEntropyLoss(weight=...) class weights not implemented
    # (the module's default weight=None is what is reproduced here).
    return ce + dice_loss


def _reference_loss(logits_nchw, labels_nhw, smooth=1.0):
    """Pure-JAX reference mirroring the PyTorch module, for a sanity check."""
    c = logits_nchw.shape[1]
    logp = jax.nn.log_softmax(logits_nchw.astype(jnp.float32), axis=1)  # (N,C,H,W)
    probs = jnp.exp(logp)
    onehot = jax.nn.one_hot(labels_nhw, c, axis=1, dtype=jnp.float32)
    ce = -jnp.mean(jnp.sum(onehot * logp, axis=1))
    dims = (0, 2, 3)
    intersection = jnp.sum(probs * onehot, axis=dims)
    cardinality = jnp.sum(probs + onehot, axis=dims)
    dice = (2.0 * intersection + smooth) / (cardinality + smooth)
    return ce + (1.0 - jnp.mean(dice))


if __name__ == "__main__":
    key = jax.random.PRNGKey(0)
    k_logits, k_labels, k_logits2, k_labels2 = jax.random.split(key, 4)

    # Primary check: shapes implied by the module's forward.
    N, C, H, W = 2, 4, 16, 16
    logits = jax.random.normal(k_logits, (N, C, H, W), dtype=jnp.float32)
    labels = jax.random.randint(k_labels, (N, H, W), 0, C, dtype=jnp.int32)

    out = jax.block_until_ready(combined_loss(logits, labels, smooth=1.0))
    ref = jax.block_until_ready(_reference_loss(logits, labels, smooth=1.0))
    assert jnp.allclose(out, ref, rtol=1e-4, atol=1e-4), (out, ref)

    # Secondary check: odd spatial size exercises the lane-padding / masking path.
    N2, C2, H2, W2 = 2, 3, 17, 19
    logits2 = jax.random.normal(k_logits2, (N2, C2, H2, W2), dtype=jnp.float32)
    labels2 = jax.random.randint(k_labels2, (N2, H2, W2), 0, C2, dtype=jnp.int32)

    out2 = jax.block_until_ready(combined_loss(logits2, labels2, smooth=1.0))
    ref2 = jax.block_until_ready(_reference_loss(logits2, labels2, smooth=1.0))
    assert jnp.allclose(out2, ref2, rtol=1e-4, atol=1e-4), (out2, ref2)

    print("KERNEL_OK")
</pallas_src>

<mosaic_0001>
module attributes {stable_mosaic.version = 11 : i64} {
  func.func @_combined_loss_kernel(%arg0: i32, %arg1: i32, %arg2: memref<1x4x256xf32, #tpu.memory_space<vmem>>, %arg3: memref<1x1x256xi32, #tpu.memory_space<vmem>>, %arg4: memref<1x4x4xf32, #tpu.memory_space<vmem>>) attributes {dimension_semantics = [#tpu.dimension_semantics<parallel>, #tpu.dimension_semantics<arbitrary>], iteration_bounds = array<i64: 2, 1>, scalar_prefetch = 0 : i64, scratch_operands = 0 : i64, tpu.core_type = #tpu.core_type<tc>, window_params = [{transform_indices = @transform_0, window_bounds = array<i64: 1, 4, 256>}, {transform_indices = @transform_1, window_bounds = array<i64: 1, 1, 256>}, {transform_indices = @transform_2, window_bounds = array<i64: 1, 4, 4>}]} {
    %c0_i32 = arith.constant 0 : i32
    %0 = arith.cmpi eq, %arg1, %c0_i32 : i32
    %1 = arith.extui %0 : i1 to i32
    %c0_i32_0 = arith.constant 0 : i32
    %2 = arith.cmpi ne, %1, %c0_i32_0 : i32
    scf.if %2 {
      %cst_20 = arith.constant 0.000000e+00 : f32
      %50 = vector.broadcast %cst_20 : f32 to vector<1x4x4xf32>
      %c0_21 = arith.constant 0 : index
      %c0_22 = arith.constant 0 : index
      %c0_23 = arith.constant 0 : index
      %51 = vector.load %arg4[%c0_21, %c0_22, %c0_23] : memref<1x4x4xf32, #tpu.memory_space<vmem>>, vector<1x4x4xf32>
      tpu.vector_store %arg4[%c0_21, %c0_22, %c0_23], %50 {strides = array<i32>} : memref<1x4x4xf32, #tpu.memory_space<vmem>>, vector<1x4x4xf32>,
    } else {
    }
    %c0 = arith.constant 0 : index
    %c0_1 = arith.constant 0 : index
    %c0_2 = arith.constant 0 : index
    %3 = vector.load %arg2[%c0, %c0_1, %c0_2] : memref<1x4x256xf32, #tpu.memory_space<vmem>>, vector<1x4x256xf32>
    %4 = vector.shape_cast %3 : vector<1x4x256xf32> to vector<4x256xf32>
    %c0_3 = arith.constant 0 : index
    %c0_4 = arith.constant 0 : index
    %c0_5 = arith.constant 0 : index
    %5 = vector.load %arg3[%c0_3, %c0_4, %c0_5] : memref<1x1x256xi32, #tpu.memory_space<vmem>>, vector<1x1x256xi32>
    %6 = vector.shape_cast %5 : vector<1x1x256xi32> to vector<1x256xi32>
    %7 = tpu.iota {dimensions = array<i32: 0>} : vector<4x256xi32>
    %c0_i32_6 = arith.constant 0 : i32
    %8 = vector.broadcast %c0_i32_6 : i32 to vector<1x256xi32>
    %9 = arith.cmpi sge, %6, %8 : vector<1x256xi32>
    %10 = arith.extui %9 : vector<1x256xi1> to vector<1x256xi32>
    %11 = arith.sitofp %10 : vector<1x256xi32> to vector<1x256xf32>
    %12 = vector.broadcast %6 : vector<1x256xi32> to vector<4x256xi32>
    %13 = arith.cmpi eq, %7, %12 : vector<4x256xi32>
    %cst = arith.constant 1.000000e+00 : f32
    %cst_7 = arith.constant 0.000000e+00 : f32
    %14 = vector.broadcast %cst : f32 to vector<4x256xf32>
    %15 = vector.broadcast %cst_7 : f32 to vector<4x256xf32>
    %16 = arith.select %13, %14, %15 : vector<4x256xi1>, vector<4x256xf32>
    %17 = vector.broadcast %11 : vector<1x256xf32> to vector<4x256xf32>
    %18 = arith.mulf %16, %17 : vector<4x256xf32>
    %cst_8 = arith.constant dense<0xFF800000> : vector<256xf32>
    %19 = vector.multi_reduction <maximumf>, %4, %cst_8 [0] : vector<4x256xf32> to vector<256xf32>
    %20 = vector.shape_cast %19 : vector<256xf32> to vector<1x256xf32>
    %21 = vector.broadcast %20 : vector<1x256xf32> to vector<4x256xf32>
    %22 = arith.subf %4, %21 : vector<4x256xf32>
    %23 = math.exp %22 : vector<4x256xf32>
    %cst_9 = arith.constant dense<0.000000e+00> : vector<256xf32>
    %24 = vector.multi_reduction <add>, %23, %cst_9 [0] : vector<4x256xf32> to vector<256xf32>
    %25 = vector.shape_cast %24 : vector<256xf32> to vector<1x256xf32>
    %26 = tpu.reciprocal %25 : vector<1x256xf32> -> vector<1x256xf32>
    %27 = math.log %25 : vector<1x256xf32>
    %28 = vector.broadcast %27 : vector<1x256xf32> to vector<4x256xf32>
    %29 = arith.subf %28, %22 : vector<4x256xf32>
    %30 = arith.mulf %18, %29 : vector<4x256xf32>
    %cst_10 = arith.constant dense<0.000000e+00> : vector<4xf32>
    %31 = vector.multi_reduction <add>, %30, %cst_10 [1] : vector<4x256xf32> to vector<4xf32>
    %32 = vector.shape_cast %31 : vector<4xf32> to vector<4x1xf32>
    %33 = arith.mulf %18, %23 : vector<4x256xf32>
    %34 = vector.broadcast %26 : vector<1x256xf32> to vector<4x256xf32>
    %35 = arith.mulf %33, %34 : vector<4x256xf32>
    %cst_11 = arith.constant dense<0.000000e+00> : vector<4xf32>
    %36 = vector.multi_reduction <add>, %35, %cst_11 [1] : vector<4x256xf32> to vector<4xf32>
    %37 = vector.shape_cast %36 : vector<4xf32> to vector<4x1xf32>
    %38 = arith.mulf %26, %11 : vector<1x256xf32>
    %39 = vector.broadcast %38 : vector<1x256xf32> to vector<4x256xf32>
    %40 = arith.mulf %23, %39 : vector<4x256xf32>
    %cst_12 = arith.constant dense<0.000000e+00> : vector<4xf32>
    %41 = vector.multi_reduction <add>, %40, %cst_12 [1] : vector<4x256xf32> to vector<4xf32>
    %42 = vector.shape_cast %41 : vector<4xf32> to vector<4x1xf32>
    %cst_13 = arith.constant dense<0.000000e+00> : vector<4xf32>
    %43 = vector.multi_reduction <add>, %18, %cst_13 [1] : vector<4x256xf32> to vector<4xf32>
    %44 = vector.shape_cast %43 : vector<4xf32> to vector<4x1xf32>
    %45 = tpu.concatenate %32, %37, %42, %44 in 1 : vector<4x1xf32>, vector<4x1xf32>, vector<4x1xf32>, vector<4x1xf32> -> vector<4x4xf32>
    %c0_14 = arith.constant 0 : index
    %c0_15 = arith.constant 0 : index
    %c0_16 = arith.constant 0 : index
    %46 = vector.load %arg4[%c0_14, %c0_15, %c0_16] : memref<1x4x4xf32, #tpu.memory_space<vmem>>, vector<1x4x4xf32>
    %47 = vector.shape_cast %45 : vector<4x4xf32> to vector<1x4x4xf32>
    %48 = arith.addf %46, %47 : vector<1x4x4xf32>
    %c0_17 = arith.constant 0 : index
    %c0_18 = arith.constant 0 : index
    %c0_19 = arith.constant 0 : index
    %49 = vector.load %arg4[%c0_17, %c0_18, %c0_19] : memref<1x4x4xf32, #tpu.memory_space<vmem>>, vector<1x4x4xf32>
    tpu.vector_store %arg4[%c0_17, %c0_18, %c0_19], %48 {strides = array<i32>} : memref<1x4x4xf32, #tpu.memory_space<vmem>>, vector<1x4x4xf32>,
    return
  }
  func.func @transform_0(%arg0: i32, %arg1: i32) -> (i32, i32, i32) {
    %c0_i32 = arith.constant 0 : i32
    %c0_i32_0 = arith.constant 0 : i32
    return %arg0, %c0_i32, %arg1 : i32, i32, i32
  }
  func.func @transform_1(%arg0: i32, %arg1: i32) -> (i32, i32, i32) {
    %c0_i32 = arith.constant 0 : i32
    %c0_i32_0 = arith.constant 0 : i32
    return %arg0, %c0_i32, %arg1 : i32, i32, i32
  }
  func.func @transform_2(%arg0: i32, %arg1: i32) -> (i32, i32, i32) {
    %c0_i32 = arith.constant 0 : i32
    %c0_i32_0 = arith.constant 0 : i32
    %c0_i32_1 = arith.constant 0 : i32
    return %arg0, %c0_i32, %c0_i32_0 : i32, i32, i32
  }
}

</mosaic_0001>

<bundles_post_ra>
// kernel: combined_loss.1
= control target key start
LH: loop header
LB: loop body
LE: loop exit
PB: predicated region body
PF: predicated region fallthrough
CT: control target
= control target key end

     0   :  { %s519_s9 = smov 0   ;;  %s521_s10 = smov 0   ;;  %s579_s0 = inlined_call_operand.vmem [shape: f32[2,4,256], index: 0, kind: input, shape index: {}]   ;;  %s580_s1 = inlined_call_operand.vmem [shape: s32[2,1,256], index: 1, kind: input, shape index: {}]   ;;  %s581_s2 = inlined_call_operand.vmem [shape: f32[2,4,4], index: 2, kind: output, shape index: {}]  }
   0x1   :  { %s523_s11 = smov 0  }
   0x2 LB: > { %s24_s12 = sadd.s32 1, %s497_s10  ;;  %p434_p0 = scmp.ge.s32.totalorder %s501_s11, 1  ;;  %s501_s11 = sphi %s523_s11, %s12_s11   ;;  %s497_s10 = sphi %s521_s10, %s583_s10   ;;  %s493_s9 = sphi %s519_s9, %s582_s9  }
   0x3   : > { %p26_p1 = scmp.ge.s32.totalorder %s24_s12, 2  ;;  %p147_p2 = scmp.lt.s32.totalorder %s501_s11, 3 }
   0x5   : > { %s585_s12 = smov (%p26_p1, %s24_s12), 0  ;;  %p148_p3 = pnand %p434_p0, %p147_p2 }
   0x6   : > { %p181_p4 = scmp.lt.s32.totalorder (!%p148_p3), %s493_s9, 1 }
   0x7   : > { %151 = sbr.rel (%p148_p3) target bundleno = 240 (0xf0), region = 28 }
   0xc   : > { %s587_s9 = smov (!%p181_p4, %s493_s9), 1  ;;  %vm244_vm0 = vcmask 1043456   ;;  %v211_v24 = vlaneseq  ;;  %v503_v42 = vmov 0.0   ;;  %vm207_vm4 = vcmask 27648  }
   0xd   : > { %s442_s13 = sshll.u32 %s587_s9, 3  ;;  %s437_s17 = sshll.u32 %s587_s9, 1  ;;  %vm338_vm5 = vcmask 7168   ;;  %vm340_vm6 = vcmask 15360   ;;  %vm342_vm7 = vcmask 23552  }
   0xe   : > { %s188_s16 = scalar_lea.vmem %s579_s0, %s442_s13  ;;  %v212_v29 = vshrl.u32 %v211_v24, 7  ;;  %s197_s20 = scalar_lea.vmem %s580_s1, %s437_s17 }
   0xf   : > { %v209_v0 = vld [vmem:[%s188_s16] sm:$0xff]  ;;  %s438_s21 = sshll.u32 %s587_s9, 2 }
  0x10   : > { %v242_v1 = vcombine.high %v209_v0, %v209_v0  ;;  %v245_v2 = vsel %vm244_vm0, %v209_v0, -inf  ;;  %v218_v34 = vsub.s32 0, %v212_v29  ;;  %v222_v35 = vsub.s32 1, %v212_v29  ;;  %v210_v39 = vld [vmem:[%s197_s20] sm:$0x3]  ;;  %s202_s24 = scalar_lea.vmem %s581_s2, %s438_s21 }
  0x11   : > { %v246_v3 = vrot.slane %v245_v2, 4  ;;  %vm213_vm1 = vcmp.ge.s32.totalorder %v210_v39, 0  ;;  %208 = vst.msk [vmem:[%s202_s24] sm:$0xf] %vm207_vm4, %v503_v42 }
  0x12   : > { %v252_v4 = vsel %vm244_vm0, %v242_v1, -inf  ;;  %v219_v40 = vrot.slane %v210_v39, %v218_v34  ;;  %v223_v41 = vrot.slane %v210_v39, %v222_v35  ;;  %v439_v43 = vsel %vm213_vm1, 1.0, %v503_v42 }
  0x13   : > { %v253_v5 = vrot.slane %v252_v4, 4  ;;  %v247_v6 = vmax.f32 %v245_v2, %v246_v3  ;;  %v232_v46 = vrot.slane %v439_v43, %v218_v34  ;;  %v236_v47 = vrot.slane %v439_v43, %v222_v35 }
  0x14   : > { %vm224_vm2 = vcmp.eq.s32.totalorder %v212_v29, %v219_v40  ;;  %vm225_vm3 = vcmp.eq.s32.totalorder %v212_v29, %v223_v41 }
  0x15   : > { %v254_v7 = vmax.f32 %v252_v4, %v253_v5  ;;  %v248_v8 = vrot.slane %v247_v6, 2  ;;  %v226_v44 = vsel %vm224_vm2, 1.0, %v503_v42  ;;  %v227_v45 = vsel %vm225_vm3, 1.0, %v503_v42 }
  0x16   : > { %v239_v48 = vmul.f32 %v232_v46, %v226_v44  ;;  %v240_v49 = vmul.f32 %v236_v47, %v227_v45 }
  0x17   : > { %v255_v9 = vrot.slane %v254_v7, 2  ;;  %v249_v10 = vmax.f32 %v247_v6, %v248_v8 }
  0x18   : > { %v344_v24 = vld [vmem:[%s202_s24] sm:$0xf] }
  0x19   : > { %v256_v11 = vmax.f32 %v254_v7, %v255_v9  ;;  %v250_v12 = vrot.slane %v249_v10, 1 }
  0x1b   : > { %v257_v13 = vrot.slane %v256_v11, 1  ;;  %v251_v14 = vmax.f32 %v249_v10, %v250_v12 }
  0x1d   : > { %v258_v15 = vmax.f32 %v256_v11, %v257_v13 }
  0x1f   : > { %v261_v16 = vcombine.low %v251_v14, %v258_v15 }
  0x21   : > { %v263_v17 = vsub.f32 %v209_v0, %v261_v16  ;;  %v333_v16 = vsel %vm244_vm0, %v239_v48, 0.0 }
  0x23   : > { %v264_v18 = vmul.f32 1.442695, %v263_v17  ;;  %v290_v52 = vcombine.high %v263_v17, %v263_v17 }
  0x25   : > { %469 = vpow2.f32 %v264_v18 }
  0x32   : > { %v545_v19 = vpop.eup %469 }
  0x33   : > { %v267_v20 = vcombine.high %v545_v19, %v545_v19  ;;  %v269_v21 = vsel %vm244_vm0, %v545_v19, 0.0  ;;  %v301_v54 = vmul.f32 %v545_v19, %v239_v48 }
  0x34   : > { %v270_v22 = vrot.slane %v269_v21, 4 }
  0x35   : > { %v276_v23 = vsel %vm244_vm0, %v267_v20, 0.0  ;;  %v302_v55 = vmul.f32 %v267_v20, %v240_v49 }
  0x36   : > { %v271_v25 = vadd.f32 %v270_v22, %v269_v21  ;;  %v277_v26 = vrot.slane %v276_v23, 4 }
  0x38   : > { %v272_v27 = vrot.slane %v271_v25, 2  ;;  %v278_v28 = vadd.f32 %v277_v26, %v276_v23 }
  0x3a   : > { %v273_v30 = vadd.f32 %v272_v27, %v271_v25  ;;  %v279_v31 = vrot.slane %v278_v28, 2 }
  0x3c   : > { %v274_v32 = vrot.slane %v273_v30, 1  ;;  %v280_v33 = vadd.f32 %v279_v31, %v278_v28 }
  0x3e   : > { %v275_v36 = vadd.f32 %v274_v32, %v273_v30  ;;  %v281_v37 = vrot.slane %v280_v33, 1 }
  0x40   : > { %v282_v38 = vadd.f32 %v281_v37, %v280_v33  ;;  %471 = vrcp.f32 %v275_v36 }
  0x41   : > { %473 = vlog2.f32 %v275_v36 }
  0x42   : > { %475 = vlog2.f32 %v282_v38 }
  0x43   : > { %477 = vrcp.f32 %v282_v38 }
  0x4d   : > { %v472_v50 = vpop.eup %471 }
  0x4e   : > { %v474_v51 = vpop.eup %473  ;;  %v310_v53 = vmul.f32 %v472_v50, %v232_v46  ;;  %v303_v0 = vmul.f32 %v472_v50, %v301_v54 }
  0x4f   : > { %v476_v56 = vpop.eup %475  ;;  %v286_v57 = vmul.f32 0.6931472, %v474_v51 }
  0x50   : > { %v478_v58 = vpop.eup %477  ;;  %v288_v59 = vmul.f32 0.6931472, %v476_v56  ;;  %v315_v62 = vrot.slane %v310_v53, %v218_v34  ;;  %v305_v8 = vsel %vm244_vm0, %v303_v0, 0.0 }
  0x51   : > { %v292_v60 = vsub.f32 %v286_v57, %v263_v17  ;;  %v311_v61 = vmul.f32 %v478_v58, %v236_v47  ;;  %v304_v1 = vmul.f32 %v478_v58, %v302_v55  ;;  %v334_v17 = vsel %vm244_vm0, %v240_v49, 0.0 }
  0x52   : > { %v293_v63 = vsub.f32 %v288_v59, %v290_v52  ;;  %v335_v20 = vadd.f32 %v334_v17, %v333_v16 }
  0x53   : > { %v294_v2 = vmul.f32 %v292_v60, %v239_v48  ;;  %v319_v3 = vrot.slane %v311_v61, %v218_v34  ;;  %v306_v9 = vsel %vm244_vm0, %v304_v1, 0.0 }
  0x54   : > { %v295_v4 = vmul.f32 %v293_v63, %v240_v49  ;;  %v307_v14 = vadd.f32 %v306_v9, %v305_v8 }
  0x55   : > { %v296_v5 = vsel %vm244_vm0, %v294_v2, 0.0  ;;  %v322_v6 = vcombine.low %v315_v62, %v319_v3 }
  0x56   : > { %v297_v7 = vsel %vm244_vm0, %v295_v4, 0.0 }
  0x57   : > { %v298_v10 = vadd.f32 %v297_v7, %v296_v5  ;;  %v324_v11 = vmul.f32 %v545_v19, %v322_v6 }
  0x59   : > { %299 = vadd.xlane.f32.xlu0 %v298_v10  ;;  %v326_v12 = vcombine.high %v324_v11, %v324_v11  ;;  %v328_v13 = vsel %vm244_vm0, %v324_v11, 0.0 }
  0x5b   : > { %v329_v15 = vsel %vm244_vm0, %v326_v12, 0.0 }
  0x5c   : > { %v330_v18 = vadd.f32 %v329_v15, %v328_v13 }
  0x5d   : > { %308 = vadd.xlane.f32.xlu0 %v307_v14 }
  0x5e   : > { %331 = vadd.xlane.f32.xlu1 %v330_v18 }
  0x62   : > { %336 = vadd.xlane.f32.xlu1 %v335_v20 }
  0xe2   : > { %v300_v19 = vpop.xlane.xlu0 %299 }
  0xe6   : > { %v309_v21 = vpop.xlane.xlu0 %308 }
  0xe7   : > { %v332_v22 = vpop.xlane.xlu1 %331  ;;  %v339_v23 = vsel %vm338_vm5, %v300_v19, %v309_v21 }
  0xe8   : > { %v341_v26 = vsel %vm340_vm6, %v339_v23, %v332_v22 }
  0xeb   : > { %v337_v25 = vpop.xlane.xlu1 %336 }
  0xec   : > { %v343_v27 = vsel %vm342_vm7, %v341_v26, %v337_v25 }
  0xed   : > { %v345_v28 = vadd.f32 %v344_v24, %v343_v27 }
  0xef   : > { %347 = vst.msk [vmem:[%s202_s24] sm:$0xf] %vm207_vm4, %v345_v28 }
  0xf0 PF: > { %s12_s11 = sadd.s32 1, %s501_s11   ;;  %s582_s9 = smov %s497_s10 }
  0xf1   : > { %p9_p5 = scmp.ge.s32.totalorder %s12_s11, 4   ;;  %s583_s10 = smov %s585_s12 }
  0xf3   :  { %11 = sbr.rel (!%p9_p5) target bundleno = 2 (0x2), region = 65 }

</bundles_post_ra>
